<compile_context>
chip_gen: v7x
topology: tpu7x:2x2x1
jax: 0.10.0
libtpu: 0.0.40
codegen_flags: <defaults>
</compile_context>

<pallas_src>
import functools

import jax
import jax.numpy as jnp
from jax import lax
from jax.experimental import pallas as pl
from jax.experimental.pallas import tpu as pltpu


# --------------------------------------------------------------------------- #
# Stage A: per-sample keep-mask kernel (grid over N)
# --------------------------------------------------------------------------- #
def _window_max_1d(x, axis: int, k: int):
    """Stride-1 window max of size k along `axis`.

    Input must have length out_len + k - 1 along `axis`; returns length out_len.
    Log-depth doubling: ceil(log2(k)) maxima instead of k-1.
    """
    cur = x
    win = 1
    while win < k:
        shift = min(win, k - win)
        length = cur.shape[axis] - shift
        a = lax.slice_in_dim(cur, 0, length, axis=axis)
        b = lax.slice_in_dim(cur, shift, shift + length, axis=axis)
        cur = jnp.maximum(a, b)
        win += shift
    return cur


def _mask_kernel(drop_ref, keep_ref, cnt_ref, pad_ref, *, block_size: int):
    # drop_ref: (1, H, W), 1.0 where a drop center was sampled.
    n = pl.program_id(0)
    _, H, W = drop_ref.shape
    p = block_size // 2

    m = drop_ref[...].astype(jnp.float32)                       # (1, H, W)
    if p > 0:
        # Pre-zeroed padded scratch (zero == identity for max of {0,1} masks);
        # avoids concat-based padding copies.
        pad_ref[...] = jnp.zeros_like(pad_ref)
        pad_ref[:, p:p + H, p:p + W] = m
        padded = pad_ref[...]                                    # (1, H+2p, W+2p)
        pooled = _window_max_1d(padded, axis=1, k=block_size)    # (1, H, W+2p)
        pooled = _window_max_1d(pooled, axis=2, k=block_size)    # (1, H, W)
    else:
        pooled = m

    keep = 1.0 - pooled                                          # 1 = keep
    keep_ref[...] = keep.astype(keep_ref.dtype)

    # Global keep count accumulated in int32 (exact; avoids f32 2^24 saturation).
    cnt = jnp.sum(keep[0].astype(jnp.int32), axis=(0, 1), keepdims=True)   # (1, 1)

    @pl.when(n == 0)
    def _():
        cnt_ref[...] = cnt

    @pl.when(n != 0)
    def _():
        cnt_ref[...] = cnt_ref[...] + cnt


# --------------------------------------------------------------------------- #
# Stage B: apply kernel (hot path, tiled + pipelined, lane-dense last dim)
# --------------------------------------------------------------------------- #
def _apply_kernel(x_ref, m_ref, scale_ref, o_ref):
    # x_ref: (1, tc, t_hw), m_ref: (1, 1, t_hw) broadcast over channels,
    # scale_ref: (1, 1) f32 in SMEM. DMA-bound -> the extra f32 math is free.
    s = scale_ref[0, 0]
    o_ref[...] = (x_ref[...].astype(jnp.float32)
                  * m_ref[...].astype(jnp.float32) * s).astype(o_ref.dtype)


def _tpu_vmem_bytes() -> int:
    try:
        return int(pltpu.get_tpu_info().vmem_capacity_bytes)
    except Exception:
        return 128 * 1024 * 1024


def _pick_tiles(C: int, HW: int, itemsize: int, budget_bytes: int):
    """Pick (channel_tile, hw_tile) so the block fits `budget_bytes` and obeys the
    TPU BlockSpec rule: dim is a multiple of (8 / 128) or equals the full extent."""
    c_cands = [C] + [d for d in range((C // 8) * 8, 7, -8) if d < C and C % d == 0]
    c_cands = sorted(set(c_cands), reverse=True)
    hw_cands = [HW] + [d for d in range((HW // 128) * 128, 127, -128)
                       if d < HW and HW % d == 0]
    hw_cands = sorted(set(hw_cands), reverse=True)

    for t_hw in hw_cands:            # prefer lane-dense (largest last dim) first
        for tc in c_cands:           # then the largest channel tile that fits
            if tc * t_hw * itemsize <= budget_bytes:
                return tc, t_hw
    # Rare fallback (awkward C/HW factorizations): smallest legal block; the
    # caller bumps vmem_limit_bytes to cover it.
    return c_cands[-1], hw_cands[-1]


def dropblock2d_apply(x, drop_mask, block_size: int):
    """Pallas-backed DropBlock application given a pre-sampled drop-center mask."""
    assert block_size % 2 == 1, "DropBlock2d requires odd block_size (holocron default 7)"
    N, C, H, W = x.shape
    HW = H * W
    itemsize = jnp.dtype(x.dtype).itemsize
    pad = block_size // 2

    # ---- Stage A: {0,1} keep mask (N,H,W) in x.dtype + global keep count ----
    keep, cnt = pl.pallas_call(
        functools.partial(_mask_kernel, block_size=block_size),
        out_shape=(jax.ShapeDtypeStruct((N, H, W), x.dtype),
                   jax.ShapeDtypeStruct((1, 1), jnp.int32)),
        grid=(N,),
        in_specs=[pl.BlockSpec((1, H, W), lambda n: (n, 0, 0))],
        out_specs=(pl.BlockSpec((1, H, W), lambda n: (n, 0, 0)),
                   pl.BlockSpec((1, 1), lambda n: (0, 0))),
        scratch_shapes=[pltpu.VMEM((1, H + 2 * pad, W + 2 * pad), jnp.float32)],
        compiler_params=pltpu.CompilerParams(
            dimension_semantics=("arbitrary",),      # count output is revisited
            vmem_limit_bytes=32 * 1024 * 1024,
        ),
    )(drop_mask)

    # Renorm scale as an f32 scalar, applied inside the apply kernel
    # (no per-element bf16 rounding of the scale baked into the mask).
    count = cnt[0, 0].astype(jnp.float32)
    numel = jnp.float32(N * H * W)
    scale = jnp.where(count > 0.0, numel / jnp.maximum(count, 1.0), jnp.float32(1.0))
    scale = scale.reshape(1, 1).astype(jnp.float32)

    # ---- Stage B: tiled, pipelined elementwise apply ----
    vmem_phys = _tpu_vmem_bytes()
    if vmem_phys <= 64 * 1024 * 1024:                 # v7x-class (64 MiB / TC)
        budget, vmem_limit, vmem_cap = 6 << 20, 44 << 20, 56 << 20
    else:                                             # v5e / v6e (128 MiB physical)
        budget, vmem_limit, vmem_cap = 4 << 20, 64 << 20, 100 << 20

    tc, t_hw = _pick_tiles(C, HW, itemsize, budget)
    n_c, n_hw = C // tc, HW // t_hw

    # v7x megacore: avoid a degenerate single-step grid for small inputs.
    if N * n_c * n_hw == 1:
        half = tc // 2
        if half >= 8 and half % 8 == 0 and C % half == 0:
            tc = half
            n_c = C // tc

    # Ensure the double-buffered footprint of the chosen block always fits.
    vmem_limit = int(min(vmem_cap, max(vmem_limit, 5 * tc * t_hw * itemsize)))

    x3 = x.reshape(N, C, HW)
    keep3 = keep.reshape(N, 1, HW)
    # TODO(synk): for late-stage maps with HW < 128 a (C//g, g*HW) group-reshape
    # would restore lane density; not needed for typical conv activations.

    if N > 1:
        # Mask block resident across the innermost C axis (fetched once per (n, hw)).
        grid = (N, n_hw, n_c)
        x_spec = pl.BlockSpec((1, tc, t_hw), lambda n, hw, c: (n, c, hw))
        m_spec = pl.BlockSpec((1, 1, t_hw), lambda n, hw, c: (n, 0, hw))
        o_spec = pl.BlockSpec((1, tc, t_hw), lambda n, hw, c: (n, c, hw))
        semantics = ("parallel", "parallel", "parallel")
    else:
        # N == 1: lead with the channel-tile axis so the megacore split stays balanced.
        grid = (n_c, n_hw)
        x_spec = pl.BlockSpec((1, tc, t_hw), lambda c, hw: (0, c, hw))
        m_spec = pl.BlockSpec((1, 1, t_hw), lambda c, hw: (0, 0, hw))
        o_spec = pl.BlockSpec((1, tc, t_hw), lambda c, hw: (0, c, hw))
        semantics = ("parallel", "parallel")

    out = pl.pallas_call(
        _apply_kernel,
        out_shape=jax.ShapeDtypeStruct((N, C, HW), x.dtype),
        grid=grid,
        in_specs=[
            x_spec,
            m_spec,
            pl.BlockSpec(memory_space=pltpu.MemorySpace.SMEM),   # (1,1) f32 scale
        ],
        out_specs=o_spec,
        compiler_params=pltpu.CompilerParams(
            dimension_semantics=semantics,
            vmem_limit_bytes=vmem_limit,
        ),
        cost_estimate=pl.CostEstimate(
            flops=2 * N * C * HW,
            transcendentals=0,
            bytes_accessed=(2 * N * C + N) * HW * itemsize + 4,
        ),
    )(x3, keep3, scale)
    return out.reshape(N, C, H, W)


def dropblock2d(x, key, p: float = 0.1, block_size: int = 7, training: bool = True):
    """Full forward pass equivalent of holocron's DropBlock2d module."""
    drop_prob = p / block_size ** 2          # module's `drop_prob` property
    if (not training) or drop_prob == 0.0:
        return x
    N, _, H, W = x.shape
    # TODO(synk): torch RNG cannot be matched bit-for-bit; centers are sampled with jax.random.
    drop_mask = (jax.random.uniform(key, (N, H, W)) < drop_prob).astype(x.dtype)
    return dropblock2d_apply(x, drop_mask, block_size)


# --------------------------------------------------------------------------- #
# Pure-JAX reference mirroring the PyTorch functional (for verification)
# --------------------------------------------------------------------------- #
def _dropblock2d_ref(x, drop_mask, block_size: int):
    pad = block_size // 2
    pooled = lax.reduce_window(
        drop_mask.astype(jnp.float32), -jnp.inf, lax.max,
        (1, block_size, block_size), (1, 1, 1),
        [(0, 0), (pad, pad), (pad, pad)],
    )
    keep = 1.0 - pooled
    out = x * keep[:, None, :, :]
    one_count = keep.sum()
    scale = jnp.where(one_count > 0.0, keep.size / jnp.maximum(one_count, 1.0), 1.0)
    return out * scale


if __name__ == "__main__":
    key = jax.random.PRNGKey(0)
    kx, kmask = jax.random.split(key)

    N, C, H, W = 2, 4, 16, 16
    p, block_size = 0.1, 7

    x = jax.random.normal(kx, (N, C, H, W), dtype=jnp.float32)

    # 1) Deterministic drop mask with a couple of centers -> exercises the pooling path.
    drop_det = (
        jnp.zeros((N, H, W), x.dtype).at[0, 5, 7].set(1.0).at[1, 12, 3].set(1.0)
    )
    out_det = jax.block_until_ready(dropblock2d_apply(x, drop_det, block_size))
    ref_det = _dropblock2d_ref(x, drop_det, block_size)
    assert out_det.shape == x.shape and out_det.dtype == x.dtype
    assert jnp.allclose(out_det, ref_det, atol=1e-5, rtol=1e-5), "mismatch vs ref (det mask)"

    # 1b) N == 1 path (exercises the 2-D grid layout).
    out_n1 = jax.block_until_ready(dropblock2d_apply(x[:1], drop_det[:1], block_size))
    ref_n1 = _dropblock2d_ref(x[:1], drop_det[:1], block_size)
    assert jnp.allclose(out_n1, ref_n1, atol=1e-5, rtol=1e-5), "mismatch vs ref (N=1)"

    # 2) Randomly sampled centers (same randomness for kernel and reference).
    drop_prob = p / block_size ** 2
    drop_rnd = (jax.random.uniform(kmask, (N, H, W)) < drop_prob).astype(x.dtype)
    out_rnd = jax.block_until_ready(dropblock2d_apply(x, drop_rnd, block_size))
    ref_rnd = _dropblock2d_ref(x, drop_rnd, block_size)
    assert jnp.allclose(out_rnd, ref_rnd, atol=1e-5, rtol=1e-5), "mismatch vs ref (rand mask)"

    # 3) Full module-equivalent path (sampling inside) + eval-mode passthrough.
    out_full = jax.block_until_ready(dropblock2d(x, kmask, p=p, block_size=block_size, training=True))
    assert out_full.shape == x.shape
    out_eval = dropblock2d(x, kmask, p=p, block_size=block_size, training=False)
    assert jnp.array_equal(out_eval, x)

    print("KERNEL_OK")
</pallas_src>

<mosaic_0001>
module attributes {stable_mosaic.version = 11 : i64} {
  func.func @_mask_kernel(%arg0: i32, %arg1: memref<1x16x16xf32, #tpu.memory_space<vmem>>, %arg2: memref<1x16x16xf32, #tpu.memory_space<vmem>>, %arg3: memref<1x1xi32, #tpu.memory_space<vmem>>, %arg4: memref<1x22x22xf32, #tpu.memory_space<vmem>>) attributes {dimension_semantics = [#tpu.dimension_semantics<arbitrary>], iteration_bounds = array<i64: 2>, scalar_prefetch = 0 : i64, scratch_operands = 1 : i64, tpu.core_type = #tpu.core_type<tc>, window_params = [{transform_indices = @transform_0, window_bounds = array<i64: 1, 16, 16>}, {transform_indices = @transform_1, window_bounds = array<i64: 1, 16, 16>}, {pipeline_mode = #tpu.pipeline_mode<synchronous>, transform_indices = @transform_2, window_bounds = array<i64: 1, 1>}]} {
    %c0 = arith.constant 0 : index
    %c0_0 = arith.constant 0 : index
    %c0_1 = arith.constant 0 : index
    %0 = vector.load %arg1[%c0, %c0_0, %c0_1] : memref<1x16x16xf32, #tpu.memory_space<vmem>>, vector<1x16x16xf32>
    %cst = arith.constant 0.000000e+00 : f32
    %1 = vector.broadcast %cst : f32 to vector<1x22x22xf32>
    %c0_2 = arith.constant 0 : index
    %c0_3 = arith.constant 0 : index
    %c0_4 = arith.constant 0 : index
    %2 = vector.load %arg4[%c0_2, %c0_3, %c0_4] : memref<1x22x22xf32, #tpu.memory_space<vmem>>, vector<1x22x22xf32>
    tpu.vector_store %arg4[%c0_2, %c0_3, %c0_4], %1 {strides = array<i32>} : memref<1x22x22xf32, #tpu.memory_space<vmem>>, vector<1x22x22xf32>,
    %c0_5 = arith.constant 0 : index
    %c3 = arith.constant 3 : index
    %c3_6 = arith.constant 3 : index
    %3 = vector.load %arg4[%c0_5, %c3, %c3_6] : memref<1x22x22xf32, #tpu.memory_space<vmem>>, vector<1x16x16xf32>
    tpu.vector_store %arg4[%c0_5, %c3, %c3_6], %0 {strides = array<i32>} : memref<1x22x22xf32, #tpu.memory_space<vmem>>, vector<1x16x16xf32>,
    %c0_7 = arith.constant 0 : index
    %c0_8 = arith.constant 0 : index
    %c0_9 = arith.constant 0 : index
    %4 = vector.load %arg4[%c0_7, %c0_8, %c0_9] : memref<1x22x22xf32, #tpu.memory_space<vmem>>, vector<1x22x22xf32>
    %5 = vector.extract_strided_slice %4 {offsets = [0, 0, 0], sizes = [1, 21, 22], strides = [1, 1, 1]} : vector<1x22x22xf32> to vector<1x21x22xf32>
    %6 = vector.extract_strided_slice %4 {offsets = [0, 1, 0], sizes = [1, 21, 22], strides = [1, 1, 1]} : vector<1x22x22xf32> to vector<1x21x22xf32>
    %7 = arith.maximumf %5, %6 : vector<1x21x22xf32>
    %8 = vector.extract_strided_slice %7 {offsets = [0, 0, 0], sizes = [1, 19, 22], strides = [1, 1, 1]} : vector<1x21x22xf32> to vector<1x19x22xf32>
    %9 = vector.extract_strided_slice %7 {offsets = [0, 2, 0], sizes = [1, 19, 22], strides = [1, 1, 1]} : vector<1x21x22xf32> to vector<1x19x22xf32>
    %10 = arith.maximumf %8, %9 : vector<1x19x22xf32>
    %11 = vector.extract_strided_slice %10 {offsets = [0, 0, 0], sizes = [1, 16, 22], strides = [1, 1, 1]} : vector<1x19x22xf32> to vector<1x16x22xf32>
    %12 = vector.extract_strided_slice %10 {offsets = [0, 3, 0], sizes = [1, 16, 22], strides = [1, 1, 1]} : vector<1x19x22xf32> to vector<1x16x22xf32>
    %13 = arith.maximumf %11, %12 : vector<1x16x22xf32>
    %14 = vector.extract_strided_slice %13 {offsets = [0, 0, 0], sizes = [1, 16, 21], strides = [1, 1, 1]} : vector<1x16x22xf32> to vector<1x16x21xf32>
    %15 = vector.extract_strided_slice %13 {offsets = [0, 0, 1], sizes = [1, 16, 21], strides = [1, 1, 1]} : vector<1x16x22xf32> to vector<1x16x21xf32>
    %16 = arith.maximumf %14, %15 : vector<1x16x21xf32>
    %17 = vector.extract_strided_slice %16 {offsets = [0, 0, 0], sizes = [1, 16, 19], strides = [1, 1, 1]} : vector<1x16x21xf32> to vector<1x16x19xf32>
    %18 = vector.extract_strided_slice %16 {offsets = [0, 0, 2], sizes = [1, 16, 19], strides = [1, 1, 1]} : vector<1x16x21xf32> to vector<1x16x19xf32>
    %19 = arith.maximumf %17, %18 : vector<1x16x19xf32>
    %20 = vector.extract_strided_slice %19 {offsets = [0, 0, 0], sizes = [1, 16, 16], strides = [1, 1, 1]} : vector<1x16x19xf32> to vector<1x16x16xf32>
    %21 = vector.extract_strided_slice %19 {offsets = [0, 0, 3], sizes = [1, 16, 16], strides = [1, 1, 1]} : vector<1x16x19xf32> to vector<1x16x16xf32>
    %22 = arith.maximumf %20, %21 : vector<1x16x16xf32>
    %cst_10 = arith.constant 1.000000e+00 : f32
    %23 = vector.broadcast %cst_10 : f32 to vector<1x16x16xf32>
    %24 = arith.subf %23, %22 : vector<1x16x16xf32>
    %c0_11 = arith.constant 0 : index
    %c0_12 = arith.constant 0 : index
    %c0_13 = arith.constant 0 : index
    %25 = vector.load %arg2[%c0_11, %c0_12, %c0_13] : memref<1x16x16xf32, #tpu.memory_space<vmem>>, vector<1x16x16xf32>
    tpu.vector_store %arg2[%c0_11, %c0_12, %c0_13], %24 {strides = array<i32>} : memref<1x16x16xf32, #tpu.memory_space<vmem>>, vector<1x16x16xf32>,
    %26 = vector.shape_cast %24 : vector<1x16x16xf32> to vector<16x16xf32>
    %27 = arith.fptosi %26 : vector<16x16xf32> to vector<16x16xi32>
    %28 = vector.shape_cast %27 : vector<16x16xi32> to vector<1x16x16xi32>
    %cst_14 = arith.constant dense<0> : vector<1xi32>
    %29 = vector.multi_reduction <add>, %28, %cst_14 [1, 2] : vector<1x16x16xi32> to vector<1xi32>
    %30 = vector.shape_cast %29 : vector<1xi32> to vector<1x1x1xi32>
    %31 = vector.extract %30[0, 0, 0] : i32 from vector<1x1x1xi32>
    %32 = vector.broadcast %31 : i32 to vector<1x1xi32>
    %c0_i32 = arith.constant 0 : i32
    %33 = arith.cmpi eq, %arg0, %c0_i32 : i32
    %34 = arith.extui %33 : i1 to i32
    %c0_i32_15 = arith.constant 0 : i32
    %35 = arith.cmpi ne, %34, %c0_i32_15 : i32
    scf.if %35 {
      %c0_18 = arith.constant 0 : index
      %c0_19 = arith.constant 0 : index
      %39 = vector.load %arg3[%c0_18, %c0_19] : memref<1x1xi32, #tpu.memory_space<vmem>>, vector<1x1xi32>
      tpu.vector_store %arg3[%c0_18, %c0_19], %32 {strides = array<i32>} : memref<1x1xi32, #tpu.memory_space<vmem>>, vector<1x1xi32>,
    } else {
    }
    %c0_i32_16 = arith.constant 0 : i32
    %36 = arith.cmpi ne, %arg0, %c0_i32_16 : i32
    %37 = arith.extui %36 : i1 to i32
    %c0_i32_17 = arith.constant 0 : i32
    %38 = arith.cmpi ne, %37, %c0_i32_17 : i32
    scf.if %38 {
      %c0_18 = arith.constant 0 : index
      %c0_19 = arith.constant 0 : index
      %39 = vector.load %arg3[%c0_18, %c0_19] : memref<1x1xi32, #tpu.memory_space<vmem>>, vector<1x1xi32>
      %40 = arith.addi %39, %32 : vector<1x1xi32>
      %c0_20 = arith.constant 0 : index
      %c0_21 = arith.constant 0 : index
      %41 = vector.load %arg3[%c0_20, %c0_21] : memref<1x1xi32, #tpu.memory_space<vmem>>, vector<1x1xi32>
      tpu.vector_store %arg3[%c0_20, %c0_21], %40 {strides = array<i32>} : memref<1x1xi32, #tpu.memory_space<vmem>>, vector<1x1xi32>,
    } else {
    }
    return
  }
  func.func @transform_0(%arg0: i32) -> (i32, i32, i32) {
    %c0_i32 = arith.constant 0 : i32
    %c0_i32_0 = arith.constant 0 : i32
    %c0_i32_1 = arith.constant 0 : i32
    return %arg0, %c0_i32, %c0_i32_0 : i32, i32, i32
  }
  func.func @transform_1(%arg0: i32) -> (i32, i32, i32) {
    %c0_i32 = arith.constant 0 : i32
    %c0_i32_0 = arith.constant 0 : i32
    %c0_i32_1 = arith.constant 0 : i32
    return %arg0, %c0_i32, %c0_i32_0 : i32, i32, i32
  }
  func.func @transform_2(%arg0: i32) -> (i32, i32) {
    %c0_i32 = arith.constant 0 : i32
    %c0_i32_0 = arith.constant 0 : i32
    %c0_i32_1 = arith.constant 0 : i32
    return %c0_i32, %c0_i32_0 : i32, i32
  }
}

</mosaic_0001>

<bundles_post_ra>
// kernel: tpu_custom_call.1
= control target key start
LH: loop header
LB: loop body
LE: loop exit
PB: predicated region body
PF: predicated region fallthrough
CT: control target
= control target key end

     0   :  { %8 = vsyncpa [#allocation4], 0  ;;  %s851_s0 = inlined_call_operand.hbm [shape: f32[2,16,16], index: 0, kind: input, shape index: {}]   ;;  %s852_s1 = inlined_call_operand.hbm [shape: f32[2,16,16], index: 1, kind: output, shape index: {0}]   ;;  %s853_s2 = inlined_call_operand.hbm [shape: s32[1,1], index: 2, kind: output, shape index: {1}]  }
   0x1   :  { %10 = vsyncpa [#allocation4 + $0x1], 0 }
   0x2   :  { %11 = vsyncpa [#allocation5], 0 }
   0x3   :  { %13 = vsyncpa [#allocation5 + $0x1], 0 }
   0x4   :  { %14 = vsyncpa [#allocation8], 0  ;;  %s651_s9 = smov 0   ;;  %s653_s10 = smov 0  }
   0x5   :  { %s655_s11 = smov 0   ;;  %s657_s12 = smov 0  }
   0x6 LB: > { %s672_s13 = sadd.s32 4294967295, %s622_s12   ;;  %s408_s14 = sadd.s32 4294967294, %s622_s12   ;;  %s622_s12 = sphi %s657_s12, %s874_s12   ;;  %s618_s11 = sphi %s655_s11, %s873_s11   ;;  %s614_s10 = sphi %s653_s10, %s872_s10   ;;  %s610_s9 = sphi %s651_s9, %s871_s9  }
   0x7   : > { %s676_s15 = sadd.s32 1, %s622_s12   ;;  %s27_s16 = sadd.s32 1, %s618_s11 }
   0x8   : > { %s24_s17 = ssub.s32 %s622_s12, %s676_s15  ;;  %p34_p0 = scmp.ne.s32.totalorder %s618_s11, %s614_s10 }
   0x9   : > { %p25_p1 = scmp.eq.s32.totalorder %s24_s17, 0  ;;  %p35_p2 = scmp.eq.s32.totalorder %s622_s12, 0 }
   0xa   : > { %p40_p3 = scmp.ne.s32.totalorder %s614_s10, %s610_s9  ;;  %p855_p4 = scmp.eq.s32.totalorder %s672_s13, 0 }
   0xb   : > { %s688_s18 = scalar_select %p25_p1, %s618_s11, %s27_s16  }
   0xc   : > { %p690_p5 = por %p35_p2, %p34_p0  ;;  %p696_p6 = por %p855_p4, %p40_p3 }
   0xd   : > { %p854_p7 = scmp.eq.s32.totalorder %s672_s13, 1  ;;  %p70_p8 = scmp.eq.s32.totalorder %s408_s14, 1 }
   0xe   : > { %p450_p10 = scmp.lt.s32.totalorder %s622_s12, 2  ;;  %s111_s23 = sand.u32 1, %s618_s11  }
   0xf   : > { %p705_p11 = por %p854_p7, %p34_p0  ;;  %p709_p12 = por %p70_p8, %p40_p3 }
  0x10   : > { %s426_s24 = sshll.u32 %s622_s12, 8  ;;  %s411_s25 = sshll.u32 %s111_s23, 4 }
  0x11   : > { %s859_s21 = scalar_select %p705_p11, 1, 0 }
  0x12   : > { %s860_s22 = scalar_select %p709_p12, 1, 0 }
  0x13   : > { %s718_s28 = scalar_lea.hbm %s851_s0, %s426_s24  ;;  %s115_s29 = scalar_lea.vmem [#allocation3], %s411_s25 }
  0x14   : > { %s122_s30 = sshll.u32 %s115_s29, 4  ;;  %p722_p13 = pnand %p450_p10, %p690_p5  ;;  %s726_s30 = int_to_ptr.vmem [resolvable:$true] %s122_s30 }
  0x15   : > { %s728_s4 = scalar_lea.sflag [#allocation4], %s111_s23  ;;  %s496_s5 = scalar_lea.hbm %s718_s28, 256 }
  0x16   : > { %p497_p0 = scmp.ne.s32.totalorder %s718_s28, %s496_s5  ;;  %p498_p1 = pneg %p722_p13 }
  0x17   : > { %s501_s8 = scalar_lea.hbm %s851_s0, 512  ;;  %p502_p5 = scmp.lt.u32.totalorder %s718_s28, %s851_s0 }
  0x18   : > { %p499_p2 = pnand %p498_p1, %p497_p0  ;;  %p503_p8 = scmp.lt.u32.totalorder %s501_s8, %s496_s5 }
  0x19   : > { %p505_p9 = scmp.lt.u32.totalorder %s496_s5, %s718_s28 }
  0x1a   : > { %p500_p3 = pneg %p499_p2  ;;  %p504_p10 = por %p503_p8, %p502_p5 }
  0x1c   : > { %p506_p7 = por %p505_p9, %p504_p10 }
  0x1e   : > { %p507_p4 = pnand %p506_p7, %p500_p3 }
  0x20   : > { %510 = shalt.err (!%p507_p4)
}
  0x21   : > { %s511_s17 = scalar_lea.vmem %s726_s30, 256  ;;  %s624_s19 = smov [#allocation3]  }
  0x22   : > { %p512_p0 = scmp.ne.s32.totalorder %s726_s30, %s511_s17  ;;  %s516_s23 = sshll.u32 %s624_s19, 4  ;;  %s517_s23 = int_to_ptr.vmem [resolvable:$false] %s516_s23 }
  0x23   : > { %s518_s24 = scalar_lea.vmem %s517_s23, 512  ;;  %p519_p11 = scmp.lt.s32.totalorder %s726_s30, %s517_s23 }
  0x24   : > { %p514_p2 = pnand %p512_p0, %p498_p1  ;;  %p520_p5 = scmp.lt.s32.totalorder %s518_s24, %s511_s17 }
  0x26   : > { %p515_p12 = pneg %p514_p2  ;;  %p521_p8 = por %p520_p5, %p519_p11 }
  0x28   : > { %p522_p9 = pnand %p521_p8, %p515_p12 }
  0x2a   : > { %525 = shalt.err (!%p522_p9)
}
  0x2b   : > { %s625_s25 = smov 128   ;;  %s626_s26 = smov 8  }
  0x2c   : > { %445 = dma.hbm_to_vmem [thread:$0]  (!%p722_p13), %s718_s28, 256, %s726_s30, %s728_s4, %s625_s25, %s625_s25, %s626_s26  }
  0x2d   : > { %p414_p4 = scmp.ge.s32.totalorder %s622_s12, 1  ;;  %p130_p7 = scmp.lt.s32.totalorder %s622_s12, 3 }
  0x2f   : > { %p131_p1 = pnand %p414_p4, %p130_p7 }
  0x30   : > { %s759_s27 = sand.u32 (!%p131_p1), 1, %s614_s10  }
  0x31   : > { %134 = sbr.rel (%p131_p1) target bundleno = 845 (0x34d), region = 24  ;;  %s415_s29 = sshll.u32 (!%p131_p1), %s759_s27, 4 }
  0x32   : > { %s137_s5 = scalar_lea.sflag (!%p131_p1), [#allocation4], %s759_s27  ;;  %s140_s6 = scalar_lea.vmem (!%p131_p1), [#allocation3], %s415_s29 }
  0x38   : > { %597 = dma.done.wait (%p696_p6), %s137_s5, 256  }
  0x39   : > { %599 = vsyncadd (%p696_p6), %s137_s5, 4294967040  ;;  %vm163_vm0 = vcmask 179200   ;;  %vm166_vm1 = vcmask 177152   ;;  %v627_v0 = vmov 0.0   ;;  %v161_v1 = vld [vmem:[%s140_s6] sm:$0xff]  ;;  %s628_s28 = smov 3  }
  0x3a   : > { %164 = vst.msk [vmem:[#allocation2] sm:$0xff] %vm163_vm0, %v627_v0  ;;  %165 = vst.msk [vmem:[#allocation2 + $0x8] sm:$0xff] %vm163_vm0, %v627_v0  ;;  %170 = vrot.lane.b32.xlu0 %v161_v1, %s628_s28  ;;  %v162_v2 = vld [vmem:[%s140_s6 + $0x8] sm:$0xff]  ;;  %vm176_vm2 = vcmask 154648   ;;  %vm185_vm3 = vcmask 1046528   ;;  %vm200_vm4 = vcmask 1045504  }
  0x3b   : > { %167 = vst.msk [vmem:[#allocation2 + $0x10] sm:$0x3f] %vm166_vm1, %v627_v0  ;;  %vm215_vm5 = vcmask 1044480   ;;  %s629_s20 = smov 127   ;;  %s630_s30 = smov 126   ;;  %vm257_vm6 = vcmask 130048  }
  0x3c   : > { %s631_s3 = smov 125   ;;  %s771_s4 = scalar_lea.vmem [#allocation6], %s415_s29 }
  0x3d   : > { %p417_p6 = scmp.ne.s32.totalorder %s672_s13, 0 }
  0x3e   : > { %172 = vrot.lane.b32.xlu0 %v162_v2, %s628_s28  ;;  %vm289_vm7 = vcmask (!%p417_p6), 0  }
  0xac   : > { %v171_v3 = vpop.permute.xlu0 %170 }
  0xad   : > { %177 = vst.msk [vmem:[#allocation2 + $0x3] sm:$0xff] %vm176_vm2, %v171_v3 }
  0xb0   : > { %v173_v4 = vpop.permute.xlu0 %172 }
  0xb1   : > { %178 = vst.msk [vmem:[#allocation2 + $0xb] sm:$0xff] %vm176_vm2, %v173_v4 }
  0xb4   : > { %v179_v5 = vld [vmem:[#allocation2] sm:$0xff] }
  0xb5   : > { %v186_v8 = vrot.slane %v179_v5, 1 }
  0xb8   : > { %v180_v6 = vld [vmem:[#allocation2 + $0x8] sm:$0xff]  ;;  %v181_v7 = vld [vmem:[#allocation2 + $0x10] sm:$0x3f] }
  0xb9   : > { %v187_v9 = vrot.slane %v180_v6, 1  ;;  %v189_v10 = vrot.slane %v181_v7, 1 }
  0xbb   : > { %v188_v11 = vsel %vm185_vm3, %v186_v8, %v187_v9  ;;  %v190_v12 = vsel %vm185_vm3, %v187_v9, %v189_v10  ;;  %v196_v13 = vmax.f32 %v181_v7, %v189_v10 }
  0xbc   : > { %v194_v14 = vmax.f32 %v179_v5, %v188_v11  ;;  %v195_v15 = vmax.f32 %v180_v6, %v190_v12 }
  0xbd   : > { %v204_v16 = vrot.slane %v196_v13, 2 }
  0xbe   : > { %v201_v17 = vrot.slane %v194_v14, 2  ;;  %v202_v18 = vrot.slane %v195_v15, 2 }
  0xbf   : > { %v211_v23 = vmax.f32 %v196_v13, %v204_v16 }
  0xc0   : > { %v203_v19 = vsel %vm200_vm4, %v201_v17, %v202_v18  ;;  %v205_v20 = vsel %vm200_vm4, %v202_v18, %v204_v16 }
  0xc1   : > { %v209_v21 = vmax.f32 %v194_v14, %v203_v19  ;;  %v210_v22 = vmax.f32 %v195_v15, %v205_v20  ;;  %v219_v27 = vrot.slane %v211_v23, 3 }
  0xc3   : > { %v216_v24 = vrot.slane %v209_v21, 3  ;;  %v217_v25 = vrot.slane %v210_v22, 3 }
  0xc5   : > { %v218_v26 = vsel %vm215_vm5, %v216_v24, %v217_v25  ;;  %v220_v29 = vsel %vm215_vm5, %v217_v25, %v219_v27 }
  0xc6   : > { %v223_v28 = vmax.f32 %v209_v21, %v218_v26  ;;  %v224_v30 = vmax.f32 %v210_v22, %v220_v29 }
  0xc8   : > { %227 = vrot.lane.b32.xlu1 %v223_v28, %s629_s20 }
  0xcc   : > { %229 = vrot.lane.b32.xlu1 %v224_v30, %s629_s20 }
 0x13a   : > { %v228_v31 = vpop.permute.xlu1 %227 }
 0x13b   : > { %v233_v32 = vmax.f32 %v223_v28, %v228_v31 }
 0x13d   : > { %237 = vrot.lane.b32.xlu0 %v233_v32, %s630_s30 }
 0x13e   : > { %v230_v33 = vpop.permute.xlu1 %229 }
 0x13f   : > { %v234_v34 = vmax.f32 %v224_v30, %v230_v33 }
 0x141   : > { %239 = vrot.lane.b32.xlu1 %v234_v34, %s630_s30 }
 0x1af   : > { %v238_v35 = vpop.permute.xlu0 %237 }
 0x1b0   : > { %v243_v36 = vmax.f32 %v233_v32, %v238_v35 }
 0x1b2   : > { %247 = vrot.lane.b32.xlu0 %v243_v36, %s631_s3 }
 0x1b3   : > { %v240_v37 = vpop.permute.xlu1 %239 }
 0x1b4   : > { %v244_v38 = vmax.f32 %v234_v34, %v240_v37 }
 0x1b6   : > { %249 = vrot.lane.b32.xlu1 %v244_v38, %s631_s3 }
 0x224   : > { %v248_v39 = vpop.permute.xlu0 %247 }
 0x225   : > { %v253_v40 = vmax.f32 %v243_v36, %v248_v39 }
 0x227   : > { %v255_v41 = vsub.f32 1.0, %v253_v40 }
 0x228   : > { %v250_v42 = vpop.permute.xlu1 %249 }
 0x229   : > { %258 = vst.msk [vmem:[%s771_s4] sm:$0xff] %vm257_vm6, %v255_v41  ;;  %v428_v43 = vtrunc.f32 %v255_v41  ;;  %v254_v44 = vmax.f32 %v244_v38, %v250_v42 }
 0x22b   : > { %v256_v45 = vsub.f32 1.0, %v254_v44  ;;  %v429_v46 = vcvt.f32.s32 %v428_v43 }
 0x22d   : > { %259 = vst.msk [vmem:[%s771_s4 + $0x8] sm:$0xff] %vm257_vm6, %v256_v45  ;;  %v430_v47 = vtrunc.f32 %v256_v45  ;;  %v262_v49 = vsel %vm257_vm6, %v429_v46, 0 }
 0x22f   : > { %v431_v48 = vcvt.f32.s32 %v430_v47 }
 0x231   : > { %v263_v50 = vsel %vm257_vm6, %v431_v48, 0 }
 0x232   : > { %v264_v51 = vadd.s32 %v263_v50, %v262_v49 }
 0x234   : > { %v266_v52 = vshrl.u32 %v264_v51, 16  ;;  %v265_v53 = vand.u32 65535, %v264_v51 }
 0x236   : > { %v268_v54 = vcvt.s32.f32 %v266_v52  ;;  %v267_v55 = vcvt.s32.f32 %v265_v53 }
 0x238   : > { %271 = vadd.xlane.f32.xlu0 %v268_v54  ;;  %269 = vadd.xlane.f32.xlu1 %v267_v55 }
 0x2c5   : > { %v272_v56 = vpop.xlane.xlu0 %271  ;;  %v270_v57 = vpop.xlane.xlu1 %269 }
 0x2c6   : > { %v274_v58 = vcvt.f32.s32 %v272_v56  ;;  %v273_v60 = vcvt.f32.s32 %v270_v57 }
 0x2c8   : > { %v275_v59 = vshll.u32 %v274_v58, 16 }
 0x2ca   : > { %v276_v61 = vadd.s32 %v275_v59, %v273_v60 }
 0x2cc   : > { %v277_v62 = vrot.slane %v276_v61, 4 }
 0x2ce   : > { %v278_v63 = vadd.s32 %v277_v62, %v276_v61 }
 0x2d0   : > { %v279_v0 = vrot.slane %v278_v63, 2 }
 0x2d2   : > { %v280_v1 = vadd.s32 %v279_v0, %v278_v63 }
 0x2d4   : > { %v281_v2 = vrot.slane %v280_v1, 1 }
 0x2d6   : > { %v282_v3 = vadd.s32 %v281_v2, %v280_v1 }
 0x2d8   : > { %432 = vpush %v282_v3 }
 0x304   : > { %288 = sbr.rel (%p417_p6) target bundleno = 780 (0x30c), region = 32 }
 0x309   : > { %s433_s7 = spop %432 }
 0x30a   : > { %v284_v4 = vstv %s433_s7 }
 0x30b   : > { %290 = vst.msk [vmem:[#allocation7] sm:$0x1] %vm289_vm7, %v284_v4 }
 0x30c PF: > { %p862_p11 = scmp.eq.s32.totalorder %s672_s13, 0 }
 0x30d   : > { %vm297_vm8 = vcmask (!%p862_p11), 0  }
 0x30e   : > { %294 = sbr.rel (%p862_p11) target bundleno = 790 (0x316), region = 36 }
 0x312   : > { %v295_v5 = vld [vmem:[#allocation7] sm:$0x1] (!%p862_p11) }
 0x313   : > { %v296_v6 = vadd.s32 (!%p862_p11), %v295_v5, %v284_v4 }
 0x315   : > { %298 = vst.msk [vmem:[#allocation7] sm:$0x1] %vm297_vm8, %v296_v6 }
 0x316 PF: > { %s427_s8 = sshll.u32 %s672_s13, 8  ;;  %s313_s19 = sshll.u32 %s771_s4, 4  ;;  %s785_s19 = int_to_ptr.vmem [resolvable:$true] %s313_s19 }
 0x317   : > { %s782_s17 = scalar_lea.hbm %s852_s1, %s427_s8  ;;  %s300_s23 = scalar_lea.sflag [#allocation5], %s759_s27 }
 0x318   : > { %s526_s24 = scalar_lea.vmem %s785_s19, 256  ;;  %p863_p13 = scmp.ne.s32.totalorder %s859_s21, 0 }
 0x319   : > { %p527_p12 = scmp.ne.s32.totalorder %s785_s19, %s526_s24  ;;  %s632_s25 = smov [#allocation6]  }
 0x31a   : > { %s530_s26 = sshll.u32 %s632_s25, 4  ;;  %s531_s26 = int_to_ptr.vmem [resolvable:$false] %s530_s26 }
 0x31b   : > { %p528_p3 = pnand %p527_p12, %p863_p13  ;;  %s532_s29 = scalar_lea.vmem %s531_s26, 512 }
 0x31c   : > { %p533_p0 = scmp.lt.s32.totalorder %s785_s19, %s531_s26  ;;  %p534_p2 = scmp.lt.s32.totalorder %s532_s29, %s526_s24 }
 0x31d   : > { %p529_p10 = pneg %p528_p3 }
 0x31e   : > { %p535_p5 = por %p534_p2, %p533_p0 }
 0x320   : > { %p536_p8 = pnand %p535_p5, %p529_p10 }
 0x322   : > { %539 = shalt.err (!%p536_p8)
}
 0x323   : > { %s540_s5 = scalar_lea.hbm %s782_s17, 256  ;;  %s544_s20 = scalar_lea.hbm %s852_s1, 512 }
 0x324   : > { %p541_p9 = scmp.ne.s32.totalorder %s782_s17, %s540_s5  ;;  %p545_p1 = scmp.lt.u32.totalorder %s782_s17, %s852_s1 }
 0x325   : > { %p546_p6 = scmp.lt.u32.totalorder %s544_s20, %s540_s5  ;;  %p548_p12 = scmp.lt.u32.totalorder %s540_s5, %s782_s17 }
 0x326   : > { %p542_p4 = pnand %p541_p9, %p863_p13 }
 0x327   : > { %p547_p11 = por %p546_p6, %p545_p1 }
 0x328   : > { %p543_p7 = pneg %p542_p4 }
 0x329   : > { %p549_p3 = por %p548_p12, %p547_p11 }
 0x32b   : > { %p550_p10 = pnand %p549_p3, %p543_p7 }
 0x32d   : > { %553 = shalt.err (!%p550_p10)
}
 0x32e   : > { %s633_s4 = smov 128   ;;  %s634_s7 = smov 8  }
 0x32f   : > { %436 = dma.vmem_to_hbm [thread:$0]  (%p863_p13), %s785_s19, 256, %s782_s17, %s300_s23, %s633_s4, %s633_s4, %s634_s7  }
 0x330   : > { %s635_s8 = smov [#allocation7]   ;;  %p864_p2 = scmp.eq.s32.totalorder %s672_s13, 1 }
 0x331   : > { %s327_s14 = sshll.u32 %s635_s8, 4  ;;  %s328_s14 = int_to_ptr.vmem [resolvable:$true] %s327_s14 }
 0x332   : > { %s554_s16 = scalar_lea.vmem %s328_s14, 16  ;;  %s560_s24 = scalar_lea.vmem %s328_s14, 32 }
 0x333   : > { %p555_p0 = scmp.ne.s32.totalorder %s328_s14, %s554_s16  ;;  %p561_p9 = scmp.lt.s32.totalorder %s328_s14, %s328_s14 }
 0x334   : > { %p562_p4 = scmp.lt.s32.totalorder %s560_s24, %s554_s16 }
 0x335   : > { %p556_p5 = pnand %p555_p0, %p864_p2 }
 0x336   : > { %p563_p7 = por %p562_p4, %p561_p9 }
 0x337   : > { %p557_p8 = pneg %p556_p5 }
 0x339   : > { %p564_p1 = pnand %p563_p7, %p557_p8 }
 0x33b   : > { %567 = shalt.err (!%p564_p1)
}
 0x33c   : > { %s568_s21 = scalar_lea.hbm %s853_s2, 16  ;;  %p865_p6 = pmov %p864_p2 }
 0x33d   : > { %p569_p13 = scmp.ne.s32.totalorder %s853_s2, %s568_s21  ;;  %p574_p3 = scmp.lt.u32.totalorder %s568_s21, %s853_s2 }
 0x33f   : > { %p570_p11 = pnand %p569_p13, %p865_p6 }
 0x341   : > { %p571_p12 = pneg %p570_p11 }
 0x343   : > { %p576_p10 = pnand %p574_p3, %p571_p12 }
 0x345   : > { %579 = shalt.err (!%p576_p10)
}
 0x346   : > { %p866_p0 = pmov %p864_p2 }
 0x348   : > { %438 = dma.vmem_to_hbm [thread:$0]  (%p866_p0), %s328_s14, 16, %s853_s2, [#allocation8]  }
 0x349   : > { %p867_p2 = pmov %p866_p0 }
 0x34a   : > { %p868_p5 = pmov %p866_p0 }
 0x34b   : > { %601 = dma.done.wait (%p867_p2), [#allocation8], 16  }
 0x34c   : > { %603 = vsyncadd (%p868_p5), [#allocation8], 4294967280 }
 0x34d PF: > { %s343_s6 = sand.u32 1, %s610_s9   ;;  %p869_p8 = scmp.ne.s32.totalorder %s860_s22, 0 }
 0x34e   : > { %p870_p9 = scmp.ge.s32.totalorder %s622_s12, 2  ;;  %s344_s28 = scalar_lea.sflag [#allocation5], %s343_s6 }
 0x350   : > { %p447_p4 = pnand %p870_p9, %p869_p8 }
 0x352   : > { %605 = dma.done.wait (!%p447_p4), %s344_s28, 256  }
 0x353   : > { %607 = vsyncadd (!%p447_p4), %s344_s28, 4294967040  ;;  %p17_p7 = scmp.ge.s32.totalorder %s676_s15, 4   ;;  %s871_s9 = smov %s614_s10 }
 0x354   : > { %s872_s10 = smov %s618_s11  ;;  %s873_s11 = smov %s688_s18 }
 0x355   : > { %s874_s12 = smov %s676_s15  ;;  %19 = sbr.rel (!%p17_p7) target bundleno = 6 (0x6), region = 85 }
 0x35c   :  { %349 = vsyncpa [#allocation4], 1 }
 0x35d   :  { %351 = vsyncpa [#allocation4 + $0x1], 1 }
 0x35e   :  { %352 = vsyncpa [#allocation5], 1 }
 0x35f   :  { %354 = vsyncpa [#allocation5 + $0x1], 1 }
 0x360   :  { %355 = vsyncpa [#allocation8], 1 }

</bundles_post_ra>
